<compile_context>
chip_gen: v7x
topology: tpu7x:2x2x1
jax: 0.10.0
libtpu: 0.0.40
codegen_flags: <defaults>
</compile_context>

<pallas_src>
import jax
import jax.numpy as jnp
from jax.experimental import pallas as pl
from jax.experimental.pallas import tpu as pltpu

IN_FEATURES = 32
NET_ARCH = (32, 32)     # hidden layer sizes
LANES = 128             # one output scalar per lane in the packed output
TB_MAX = 4096           # batch rows per grid step (multiple of 1024)


def _round_up(n, m):
    return ((n + m - 1) // m) * m


def ffn_kernel(x_ref, w1_ref, b1_ref, w2_ref, b2_ref, w3_ref, b3_ref, o_ref):
    # x:  [tb, IN] f32 (cast to bf16 here; no wrapper astype pass)
    # w1/w2: bf16 [in, out] ; b1/b2: f32 [1, out]
    # w3: f32 [1, H2] (final weight as a row) ; b3: f32 [1, 1]
    # o:  f32 [tb // 128, 128]  (lane-packed per-row scalars)
    g, lanes = o_ref.shape

    x = x_ref[...].astype(jnp.bfloat16)

    # Linear + ReLU (MXU bf16 matmul, f32 accumulate)
    h1 = jnp.dot(x, w1_ref[...], preferred_element_type=jnp.float32) + b1_ref[...]
    h1 = jnp.maximum(h1, 0.0)
    # Linear + ReLU
    h2 = jnp.dot(h1.astype(jnp.bfloat16), w2_ref[...],
                 preferred_element_type=jnp.float32) + b2_ref[...]
    h2 = jnp.maximum(h2, 0.0)

    # Final Linear(->1): VPU multiply + lane reduction against the w3 row.
    # Splitting the sublane dim first is a free reshape (minor dim untouched)
    # so the reduction directly yields a lane-dense [tb//128, 128] block.
    h2r = h2.reshape(g, lanes, h2.shape[-1])
    y = jnp.sum(h2r * w3_ref[...], axis=-1) + b3_ref[...]     # [g, 128]

    # Tanh (squash_output=True) then (action + 1) * 0.5.
    o_ref[...] = (jnp.tanh(y) + 1.0) * 0.5


def ffn_forward(obs, params):
    """obs: dict with 'obs' -> [batch, in_features] f32. Returns [batch] f32."""
    x = obs["obs"]
    batch = x.shape[0]
    w1, b1, w2, b2, w3, b3 = params

    batch128 = _round_up(batch, LANES)
    if batch128 <= 1024:
        # Single tile; block == (row-padded) full array.  Padding here copies
        # at most 1024 x 32 floats — negligible — and guarantees the block
        # never exceeds the array extent.
        tb = batch128
        if batch128 != batch:
            x = jnp.pad(x, ((0, batch128 - batch), (0, 0)))
        grid0 = 1
    else:
        # tb is a multiple of 1024 so the packed out block is (8k, 128);
        # aim for >= 2 grid steps so both v7x TensorCores get work.  The last
        # x block may be partially valid (no full jnp.pad pass over the big
        # input); garbage tail rows are sliced off below.
        tb = min(TB_MAX, _round_up((batch128 + 1) // 2, 1024))
        grid0 = pl.cdiv(batch, tb)

    batch_pad = grid0 * tb
    d1, d2 = NET_ARCH

    out = pl.pallas_call(
        ffn_kernel,
        grid=(grid0,),
        in_specs=[
            pl.BlockSpec((tb, IN_FEATURES), lambda i: (i, 0)),    # x tile
            pl.BlockSpec((IN_FEATURES, d1), lambda i: (0, 0)),    # w1 (resident)
            pl.BlockSpec((1, d1), lambda i: (0, 0)),              # b1
            pl.BlockSpec((d1, d2), lambda i: (0, 0)),             # w2
            pl.BlockSpec((1, d2), lambda i: (0, 0)),              # b2
            pl.BlockSpec((1, d2), lambda i: (0, 0)),              # w3 row
            pl.BlockSpec((1, 1), lambda i: (0, 0)),               # b3
        ],
        out_specs=pl.BlockSpec((tb // LANES, LANES), lambda i: (i, 0)),
        out_shape=jax.ShapeDtypeStruct((batch_pad // LANES, LANES), jnp.float32),
        compiler_params=pltpu.CompilerParams(
            dimension_semantics=("parallel",),
            vmem_limit_bytes=32 * 1024 * 1024),
    )(x, w1, b1, w2, b2, w3, b3)

    # Lane-packed [batch_pad//128, 128] -> flatten(0) -> drop padding rows.
    return out.reshape(-1)[:batch]


def init_params(key):
    d1, d2 = NET_ARCH
    k = jax.random.split(key, 6)
    # Weights stored as [in, out] (transposed vs torch nn.Linear [out, in]).
    w1 = jax.random.normal(k[0], (IN_FEATURES, d1), jnp.float32) * 0.1
    b1 = jax.random.normal(k[1], (1, d1), jnp.float32) * 0.1
    w2 = jax.random.normal(k[2], (d1, d2), jnp.float32) * 0.1
    b2 = jax.random.normal(k[3], (1, d2), jnp.float32) * 0.1
    w3 = jax.random.normal(k[4], (1, d2), jnp.float32) * 0.1   # final weight as a row
    b3 = jax.random.normal(k[5], (1, 1), jnp.float32) * 0.1
    # Hidden-layer matmul weights in bf16 (MXU-native); small vectors stay f32.
    return (w1.astype(jnp.bfloat16), b1, w2.astype(jnp.bfloat16), b2, w3, b3)


def ffn_reference(x, params):
    """Pure-JAX reference mirroring the kernel's bf16-matmul / f32-accum math."""
    w1, b1, w2, b2, w3, b3 = params
    h = jnp.maximum(jnp.dot(x.astype(jnp.bfloat16), w1,
                            preferred_element_type=jnp.float32) + b1, 0.0)
    h = jnp.maximum(jnp.dot(h.astype(jnp.bfloat16), w2,
                            preferred_element_type=jnp.float32) + b2, 0.0)
    y = jnp.tanh(jnp.sum(h * w3, axis=-1) + b3[0, 0])          # [batch]
    return (y + 1.0) * 0.5


if __name__ == "__main__":
    key = jax.random.PRNGKey(0)
    k_param, k_obs1, k_obs2 = jax.random.split(key, 3)

    params = init_params(k_param)

    # Small-shape check (single tile, row-padded block).
    batch = 8
    x = jax.random.normal(k_obs1, (batch, IN_FEATURES), jnp.float32)
    out = jax.block_until_ready(ffn_forward({"obs": x}, params))
    ref = ffn_reference(x, params)
    assert out.shape == (batch,), out.shape
    assert jnp.allclose(out, ref, atol=1e-4, rtol=1e-4), (out, ref)

    # Multi-tile check: non-multiple-of-128 batch exercises the grid index
    # maps, the partially-valid last block and the lane-packed output reshape.
    batch2 = 3000
    x2 = jax.random.normal(k_obs2, (batch2, IN_FEATURES), jnp.float32)
    out2 = jax.block_until_ready(ffn_forward({"obs": x2}, params))
    ref2 = ffn_reference(x2, params)
    assert out2.shape == (batch2,), out2.shape
    assert jnp.allclose(out2, ref2, atol=1e-4, rtol=1e-4)

    print("KERNEL_OK")
</pallas_src>

<mosaic_0001>
module attributes {stable_mosaic.version = 11 : i64} {
  func.func @ffn_kernel(%arg0: i32, %arg1: memref<128x32xf32, #tpu.memory_space<vmem>>, %arg2: memref<32x32xbf16, #tpu.memory_space<vmem>>, %arg3: memref<1x32xf32, #tpu.memory_space<vmem>>, %arg4: memref<32x32xbf16, #tpu.memory_space<vmem>>, %arg5: memref<1x32xf32, #tpu.memory_space<vmem>>, %arg6: memref<1x32xf32, #tpu.memory_space<vmem>>, %arg7: memref<1x1xf32, #tpu.memory_space<vmem>>, %arg8: memref<1x128xf32, #tpu.memory_space<vmem>>) attributes {dimension_semantics = [#tpu.dimension_semantics<parallel>], iteration_bounds = array<i64: 1>, scalar_prefetch = 0 : i64, scratch_operands = 0 : i64, tpu.core_type = #tpu.core_type<tc>, window_params = [{transform_indices = @transform_0, window_bounds = array<i64: 128, 32>}, {pipeline_mode = #tpu.pipeline_mode<synchronous>, transform_indices = @transform_1, window_bounds = array<i64: 32, 32>}, {pipeline_mode = #tpu.pipeline_mode<synchronous>, transform_indices = @transform_2, window_bounds = array<i64: 1, 32>}, {pipeline_mode = #tpu.pipeline_mode<synchronous>, transform_indices = @transform_3, window_bounds = array<i64: 32, 32>}, {pipeline_mode = #tpu.pipeline_mode<synchronous>, transform_indices = @transform_4, window_bounds = array<i64: 1, 32>}, {pipeline_mode = #tpu.pipeline_mode<synchronous>, transform_indices = @transform_5, window_bounds = array<i64: 1, 32>}, {pipeline_mode = #tpu.pipeline_mode<synchronous>, transform_indices = @transform_6, window_bounds = array<i64: 1, 1>}, {transform_indices = @transform_7, window_bounds = array<i64: 1, 128>}]} {
    %c0 = arith.constant 0 : index
    %c0_0 = arith.constant 0 : index
    %0 = vector.load %arg1[%c0, %c0_0] : memref<128x32xf32, #tpu.memory_space<vmem>>, vector<128x32xf32>
    %1 = arith.truncf %0 : vector<128x32xf32> to vector<128x32xbf16>
    %c0_1 = arith.constant 0 : index
    %c0_2 = arith.constant 0 : index
    %2 = vector.load %arg2[%c0_1, %c0_2] : memref<32x32xbf16, #tpu.memory_space<vmem>>, vector<32x32xbf16>
    %cst = arith.constant dense<0.000000e+00> : vector<128x32xf32>
    %3 = tpu.matmul %1, %2, %cst {dimension_numbers = #tpu.dot_dimension_numbers<[1], [0], [0], [1], [0, 0, 1, 1], [], []>} : vector<128x32xbf16>, vector<32x32xbf16>, vector<128x32xf32> -> vector<128x32xf32>
    %c0_3 = arith.constant 0 : index
    %c0_4 = arith.constant 0 : index
    %4 = vector.load %arg3[%c0_3, %c0_4] : memref<1x32xf32, #tpu.memory_space<vmem>>, vector<1x32xf32>
    %5 = vector.broadcast %4 : vector<1x32xf32> to vector<128x32xf32>
    %6 = arith.addf %3, %5 : vector<128x32xf32>
    %cst_5 = arith.constant 0.000000e+00 : f32
    %7 = vector.broadcast %cst_5 : f32 to vector<128x32xf32>
    %8 = arith.maximumf %6, %7 : vector<128x32xf32>
    %9 = arith.truncf %8 : vector<128x32xf32> to vector<128x32xbf16>
    %c0_6 = arith.constant 0 : index
    %c0_7 = arith.constant 0 : index
    %10 = vector.load %arg4[%c0_6, %c0_7] : memref<32x32xbf16, #tpu.memory_space<vmem>>, vector<32x32xbf16>
    %cst_8 = arith.constant dense<0.000000e+00> : vector<128x32xf32>
    %11 = tpu.matmul %9, %10, %cst_8 {dimension_numbers = #tpu.dot_dimension_numbers<[1], [0], [0], [1], [0, 0, 1, 1], [], []>} : vector<128x32xbf16>, vector<32x32xbf16>, vector<128x32xf32> -> vector<128x32xf32>
    %c0_9 = arith.constant 0 : index
    %c0_10 = arith.constant 0 : index
    %12 = vector.load %arg5[%c0_9, %c0_10] : memref<1x32xf32, #tpu.memory_space<vmem>>, vector<1x32xf32>
    %13 = vector.broadcast %12 : vector<1x32xf32> to vector<128x32xf32>
    %14 = arith.addf %11, %13 : vector<128x32xf32>
    %cst_11 = arith.constant 0.000000e+00 : f32
    %15 = vector.broadcast %cst_11 : f32 to vector<128x32xf32>
    %16 = arith.maximumf %14, %15 : vector<128x32xf32>
    %17 = vector.shape_cast %16 : vector<128x32xf32> to vector<1x128x32xf32>
    %c0_12 = arith.constant 0 : index
    %c0_13 = arith.constant 0 : index
    %18 = vector.load %arg6[%c0_12, %c0_13] : memref<1x32xf32, #tpu.memory_space<vmem>>, vector<1x32xf32>
    %19 = vector.shape_cast %18 : vector<1x32xf32> to vector<1x1x32xf32>
    %20 = vector.broadcast %19 : vector<1x1x32xf32> to vector<1x128x32xf32>
    %21 = arith.mulf %17, %20 : vector<1x128x32xf32>
    %cst_14 = arith.constant dense<0.000000e+00> : vector<1x128xf32>
    %22 = vector.multi_reduction <add>, %21, %cst_14 [2] : vector<1x128x32xf32> to vector<1x128xf32>
    %c0_15 = arith.constant 0 : index
    %c0_16 = arith.constant 0 : index
    %23 = vector.load %arg7[%c0_15, %c0_16] : memref<1x1xf32, #tpu.memory_space<vmem>>, vector<1x1xf32>
    %24 = vector.broadcast %23 : vector<1x1xf32> to vector<1x128xf32>
    %25 = arith.addf %22, %24 : vector<1x128xf32>
    %26 = math.tanh %25 : vector<1x128xf32>
    %cst_17 = arith.constant 1.000000e+00 : f32
    %27 = vector.broadcast %cst_17 : f32 to vector<1x128xf32>
    %28 = arith.addf %26, %27 : vector<1x128xf32>
    %cst_18 = arith.constant 5.000000e-01 : f32
    %29 = vector.broadcast %cst_18 : f32 to vector<1x128xf32>
    %30 = arith.mulf %28, %29 : vector<1x128xf32>
    %c0_19 = arith.constant 0 : index
    %c0_20 = arith.constant 0 : index
    %31 = vector.load %arg8[%c0_19, %c0_20] : memref<1x128xf32, #tpu.memory_space<vmem>>, vector<1x128xf32>
    tpu.vector_store %arg8[%c0_19, %c0_20], %30 {strides = array<i32>} : memref<1x128xf32, #tpu.memory_space<vmem>>, vector<1x128xf32>,
    return
  }
  func.func @transform_0(%arg0: i32) -> (i32, i32) {
    %c0_i32 = arith.constant 0 : i32
    %c0_i32_0 = arith.constant 0 : i32
    return %arg0, %c0_i32 : i32, i32
  }
  func.func @transform_1(%arg0: i32) -> (i32, i32) {
    %c0_i32 = arith.constant 0 : i32
    %c0_i32_0 = arith.constant 0 : i32
    %c0_i32_1 = arith.constant 0 : i32
    return %c0_i32, %c0_i32_0 : i32, i32
  }
  func.func @transform_2(%arg0: i32) -> (i32, i32) {
    %c0_i32 = arith.constant 0 : i32
    %c0_i32_0 = arith.constant 0 : i32
    %c0_i32_1 = arith.constant 0 : i32
    return %c0_i32, %c0_i32_0 : i32, i32
  }
  func.func @transform_3(%arg0: i32) -> (i32, i32) {
    %c0_i32 = arith.constant 0 : i32
    %c0_i32_0 = arith.constant 0 : i32
    %c0_i32_1 = arith.constant 0 : i32
    return %c0_i32, %c0_i32_0 : i32, i32
  }
  func.func @transform_4(%arg0: i32) -> (i32, i32) {
    %c0_i32 = arith.constant 0 : i32
    %c0_i32_0 = arith.constant 0 : i32
    %c0_i32_1 = arith.constant 0 : i32
    return %c0_i32, %c0_i32_0 : i32, i32
  }
  func.func @transform_5(%arg0: i32) -> (i32, i32) {
    %c0_i32 = arith.constant 0 : i32
    %c0_i32_0 = arith.constant 0 : i32
    %c0_i32_1 = arith.constant 0 : i32
    return %c0_i32, %c0_i32_0 : i32, i32
  }
  func.func @transform_6(%arg0: i32) -> (i32, i32) {
    %c0_i32 = arith.constant 0 : i32
    %c0_i32_0 = arith.constant 0 : i32
    %c0_i32_1 = arith.constant 0 : i32
    return %c0_i32, %c0_i32_0 : i32, i32
  }
  func.func @transform_7(%arg0: i32) -> (i32, i32) {
    %c0_i32 = arith.constant 0 : i32
    %c0_i32_0 = arith.constant 0 : i32
    return %arg0, %c0_i32 : i32, i32
  }
}

</mosaic_0001>

<bundles_post_ra>
// kernel: tpu_custom_call.1
= control target key start
LH: loop header
LB: loop body
LE: loop exit
PB: predicated region body
PF: predicated region fallthrough
CT: control target
= control target key end

     0   :  { %s1070_s0 = inlined_call_operand.vmem [shape: f32[128,32], index: 0, kind: input, shape index: {}]   ;;  %s1071_s1 = inlined_call_operand.vmem [shape: bf16[32,32], index: 1, kind: input, shape index: {}]   ;;  %s1072_s2 = inlined_call_operand.vmem [shape: f32[1,32], index: 2, kind: input, shape index: {}]   ;;  %s1073_s3 = inlined_call_operand.vmem [shape: bf16[32,32], index: 3, kind: input, shape index: {}]   ;;  %s1074_s4 = inlined_call_operand.vmem [shape: f32[1,32], index: 4, kind: input, shape index: {}]   ;;  %s1075_s5 = inlined_call_operand.vmem [shape: f32[1,32], index: 5, kind: input, shape index: {}]   ;;  %s1076_s6 = inlined_call_operand.<no memory space> [shape: f32[1,1], index: 6, kind: input, shape index: {}]   ;;  %s1077_s7 = inlined_call_operand.hbm [shape: f32[1,128], index: 7, kind: output, shape index: {}]  }
   0x1   :  { %v12_v0 = vstv %s1076_s6 }
   0x2   :  { %13 = vst [vmem:[#allocation2] sm:$0x1] %v12_v0 }
   0x3   :  { %v758_v1 = vld [vmem:[%s1071_s1] sm:$0xff]   ;;  %v759_v2 = vld [vmem:[%s1071_s1 + $0x8] sm:$0xff]   ;;  %vm77_vm0 = vcmask 261120   ;;  %v32_v6 = vld [vmem:[%s1070_s0 + $0x10] sm:$0xff] }
   0x4   :  { %714 = vmatprep.subr.bf16.mxu0 %v758_v1  ;;  %v30_v3 = vld [vmem:[%s1070_s0] sm:$0xff]  ;;  %v31_v4 = vld [vmem:[%s1070_s0 + $0x8] sm:$0xff]  ;;  %v33_v7 = vld [vmem:[%s1070_s0 + $0x18] sm:$0xff] }
   0x5   :  { %715 = vmatpush3.bf16.msra.mxu0 %v758_v1  ;;  %v46_v5 = vpack.c.bf16 %v31_v4, %v30_v3  ;;  %v34_v8 = vld [vmem:[%s1070_s0 + $0x20] sm:$0xff]  ;;  %v35_v9 = vld [vmem:[%s1070_s0 + $0x28] sm:$0xff]  ;;  %v47_v10 = vpack.c.bf16 %v33_v7, %v32_v6 }
   0x6   :  { %716 = vmatprep.subr.bf16.mxu0 %v759_v2  ;;  %v48_v11 = vpack.c.bf16 %v35_v9, %v34_v8 }
   0x7   :  { %718 = vmatprep.mubr.msk.bf16.mxu0 %vm77_vm0, %v46_v5 }
   0x9   :  { %717 = vmatpush3.bf16.msra.mxu0 %v759_v2 }
   0xa   :  { %14 = vsyncpa [#allocation4], 0  ;;  %v36_v12 = vld [vmem:[%s1070_s0 + $0x30] sm:$0xff]  ;;  %v37_v13 = vld [vmem:[%s1070_s0 + $0x38] sm:$0xff]  ;;  %vm555_vm1 = vcmask 130112   ;;  %vm562_vm2 = vcmask 195712  }
   0xb   :  { %v38_v14 = vld [vmem:[%s1070_s0 + $0x40] sm:$0xff]  ;;  %v39_v15 = vld [vmem:[%s1070_s0 + $0x48] sm:$0xff]  ;;  %v49_v16 = vpack.c.bf16 %v37_v13, %v36_v12  ;;  %v40_v18 = vld [vmem:[%s1070_s0 + $0x50] sm:$0xff]  ;;  %vm569_vm3 = vcmask 261312   ;;  %vm576_vm4 = vcmask 326912   ;;  %vm583_vm5 = vcmask 392512  }
   0xc   :  { %719 = vmatmul.mubr.msk.bf16.vlgmr.msra.gmra.mrb[0].mxu0 %vm77_vm0, %v47_v10  ;;  %v50_v17 = vpack.c.bf16 %v39_v15, %v38_v14  ;;  %v41_v19 = vld [vmem:[%s1070_s0 + $0x58] sm:$0xff]  ;;  %v42_v20 = vld [vmem:[%s1070_s0 + $0x60] sm:$0xff]  ;;  %v43_v21 = vld [vmem:[%s1070_s0 + $0x68] sm:$0xff]  ;;  %vm590_vm6 = vcmask 458112   ;;  %vm597_vm7 = vcmask 523712   ;;  %vm604_vm8 = vcmask 589312  }
   0xd   :  { %722 = vmatprep.mubr.msk.bf16.mxu0 %vm77_vm0, %v48_v11  ;;  %v51_v22 = vpack.c.bf16 %v41_v19, %v40_v18  ;;  %v52_v23 = vpack.c.bf16 %v43_v21, %v42_v20  ;;  %v44_v24 = vld [vmem:[%s1070_s0 + $0x70] sm:$0xff]  ;;  %v45_v25 = vld [vmem:[%s1070_s0 + $0x78] sm:$0xff]  ;;  %v760_v27 = vld [vmem:[%s1073_s3] sm:$0xff]   ;;  %vm611_vm9 = vcmask 654912   ;;  %vm618_vm10 = vcmask 720512  }
   0xe   :  { %v53_v26 = vpack.c.bf16 %v45_v25, %v44_v24  ;;  %734 = vmatprep.subr.bf16.mxu1 %v760_v27  ;;  %v761_v28 = vld [vmem:[%s1073_s3 + $0x8] sm:$0xff]   ;;  %v671_v29 = vld [vmem:[%s1072_s2] ss:$0 sm:$0xff]  ;;  %vm625_vm11 = vcmask 786112   ;;  %vm632_vm12 = vcmask 851712   ;;  %vm639_vm13 = vcmask 917312  }
   0xf   :  { %735 = vmatpush3.bf16.msra.mxu1 %v760_v27  ;;  %vm646_vm14 = vcmask 982912   ;;  %vm653_vm15 = vcmask 1048512  }
  0x10   :  { %736 = vmatprep.subr.bf16.mxu1 %v761_v28 }
  0x13   :  { %737 = vmatpush3.bf16.msra.mxu1 %v761_v28 }
  0x14   :  { %723 = vmatmul.mubr.msk.bf16.gmra.mrb[4].mxu0 %vm77_vm0, %v49_v16 }
  0x15   :  { %726 = vmatprep.mubr.msk.bf16.mxu0 %vm77_vm0, %v50_v17 }
  0x1c   :  { %727 = vmatmul.mubr.msk.bf16.gmra.mrb[8].mxu0 %vm77_vm0, %v51_v22  ;;  %v818_v22 = vmov 0  }
  0x1d   :  { %730 = vmatprep.mubr.msk.bf16.mxu0 %vm77_vm0, %v52_v23  ;;  %756 = vset.pattern.permute.xlu1 %v818_v22  ;;  %v945_v23 = vld [vmem:[%s1074_s4] ss:$0 sm:$0xff]  ;;  %s819_s4 = smov [#allocation3]  }
  0x1e   :  { %757 = vset.pattern.permute.xlu0 %v818_v22 }
  0x24   :  { %731 = vmatmul.mubr.msk.bf16.gmra.mrb[12].mxu0 %vm77_vm0, %v53_v26 }
  0xdf   :  { %v720_v30 = vpop.f32.mrb[0].mxu0 }
  0xe0   :  { %v145_v31 = vadd.f32 %v720_v30, %v671_v29  ;;  %v136_v32 = vpop.f32.mrb[1].mxu0 }
  0xe1   :  { %v137_v33 = vadd.f32 %v671_v29, %v136_v32  ;;  %v721_v34 = vpop.f32.mrb[2].mxu0 }
  0xe2   :  { %v148_v35 = vadd.f32 %v721_v34, %v671_v29  ;;  %v139_v36 = vpop.f32.mrb[3].mxu0  ;;  %v201_v38 = vmax.f32 %v145_v31, 0.0 }
  0xe3   :  { %v140_v37 = vadd.f32 %v671_v29, %v139_v36  ;;  %v199_v40 = vmax.f32 %v137_v33, 0.0 }
  0xe4   :  { %v202_v39 = vmax.f32 %v148_v35, 0.0 }
  0xe5   :  { %v200_v41 = vmax.f32 %v140_v37, 0.0 }
  0xe6   :  { %v216_v42 = vpack.c.bf16 %v202_v39, %v201_v38 }
  0xe7   :  { %v724_v43 = vpop.f32.mrb[4].mxu0  ;;  %v215_v44 = vpack.c.bf16 %v200_v41, %v199_v40 }
  0xe8   :  { %v161_v45 = vadd.f32 %v724_v43, %v671_v29  ;;  %v152_v46 = vpop.f32.mrb[5].mxu0 }
  0xe9   :  { %v153_v47 = vadd.f32 %v671_v29, %v152_v46  ;;  %v725_v48 = vpop.f32.mrb[6].mxu0  ;;  %738 = vmatprep.mubr.msk.bf16.mxu1 %vm77_vm0, %v215_v44 }
  0xea   :  { %v164_v49 = vadd.f32 %v725_v48, %v671_v29  ;;  %v155_v50 = vpop.f32.mrb[7].mxu0  ;;  %739 = vmatmul.mubr.msk.bf16.vlgmr.msra.gmra.mrb[0].mxu1 %vm77_vm0, %v216_v42  ;;  %v205_v52 = vmax.f32 %v161_v45, 0.0 }
  0xeb   :  { %v156_v51 = vadd.f32 %v671_v29, %v155_v50  ;;  %v203_v54 = vmax.f32 %v153_v47, 0.0 }
  0xec   :  { %v206_v53 = vmax.f32 %v164_v49, 0.0 }
  0xed   :  { %v204_v55 = vmax.f32 %v156_v51, 0.0 }
  0xee   :  { %v218_v56 = vpack.c.bf16 %v206_v53, %v205_v52 }
  0xef   :  { %v217_v57 = vpack.c.bf16 %v204_v55, %v203_v54  ;;  %v728_v58 = vpop.f32.mrb[8].mxu0 }
  0xf0   :  { %v177_v59 = vadd.f32 %v728_v58, %v671_v29  ;;  %v168_v60 = vpop.f32.mrb[9].mxu0 }
  0xf1   :  { %742 = vmatprep.mubr.msk.bf16.mxu1 %vm77_vm0, %v217_v57  ;;  %v169_v61 = vadd.f32 %v671_v29, %v168_v60  ;;  %v729_v62 = vpop.f32.mrb[10].mxu0 }
  0xf2   :  { %743 = vmatmul.mubr.msk.bf16.gmra.mrb[4].mxu1 %vm77_vm0, %v218_v56  ;;  %v209_v63 = vmax.f32 %v177_v59, 0.0  ;;  %v180_v0 = vadd.f32 %v729_v62, %v671_v29  ;;  %v171_v1 = vpop.f32.mrb[11].mxu0 }
  0xf3   :  { %v207_v2 = vmax.f32 %v169_v61, 0.0  ;;  %v172_v3 = vadd.f32 %v671_v29, %v171_v1 }
  0xf4   :  { %v210_v4 = vmax.f32 %v180_v0, 0.0 }
  0xf5   :  { %v208_v5 = vmax.f32 %v172_v3, 0.0 }
  0xf6   :  { %v220_v6 = vpack.c.bf16 %v210_v4, %v209_v63 }
  0xf7   :  { %v219_v7 = vpack.c.bf16 %v208_v5, %v207_v2  ;;  %v732_v8 = vpop.f32.mrb[12].mxu0 }
  0xf8   :  { %v193_v9 = vadd.f32 %v732_v8, %v671_v29  ;;  %v184_v10 = vpop.f32.mrb[13].mxu0 }
  0xf9   :  { %746 = vmatprep.mubr.msk.bf16.mxu1 %vm77_vm0, %v219_v7  ;;  %v185_v11 = vadd.f32 %v671_v29, %v184_v10  ;;  %v733_v12 = vpop.f32.mrb[14].mxu0 }
  0xfa   :  { %747 = vmatmul.mubr.msk.bf16.gmra.mrb[8].mxu1 %vm77_vm0, %v220_v6  ;;  %v213_v13 = vmax.f32 %v193_v9, 0.0  ;;  %v196_v14 = vadd.f32 %v733_v12, %v671_v29  ;;  %v187_v15 = vpop.f32.mrb[15].mxu0 }
  0xfb   :  { %v211_v16 = vmax.f32 %v185_v11, 0.0  ;;  %v188_v17 = vadd.f32 %v671_v29, %v187_v15  ;;  %v952_v29 = vld [vmem:[%s1075_s5] ss:$0 sm:$0xff]  ;;  %s663_s5 = sshll.u32 %s819_s4, 4  ;;  %s664_s5 = int_to_ptr.vmem [resolvable:$true] %s663_s5 }
  0xfc   :  { %v214_v18 = vmax.f32 %v196_v14, 0.0  ;;  %s794_s19 = scalar_lea.vmem %s664_s5, 16  ;;  %s798_s20 = scalar_lea.vmem %s664_s5, 32 }
  0xfd   :  { %v212_v19 = vmax.f32 %v188_v17, 0.0  ;;  %p795_p0 = scmp.ne.s32.totalorder %s664_s5, %s794_s19  ;;  %p799_p1 = scmp.lt.s32.totalorder %s664_s5, %s664_s5 }
  0xfe   :  { %v222_v20 = vpack.c.bf16 %v214_v18, %v213_v13  ;;  %p800_p2 = scmp.lt.s32.totalorder %s798_s20, %s794_s19 }
  0xff   :  { %v221_v21 = vpack.c.bf16 %v212_v19, %v211_v16 }
 0x100   :  { %p801_p3 = por %p800_p2, %p799_p1 }
 0x101   :  { %750 = vmatprep.mubr.msk.bf16.mxu1 %vm77_vm0, %v221_v21 }
 0x102   :  { %751 = vmatmul.mubr.msk.bf16.gmra.mrb[12].mxu1 %vm77_vm0, %v222_v20  ;;  %p802_p4 = pnand %p801_p3, %p795_p0 }
 0x1bd   :  { %v740_v24 = vpop.f32.mrb[0].mxu1 }
 0x1be   :  { %v313_v25 = vadd.f32 %v740_v24, %v945_v23  ;;  %v304_v26 = vpop.f32.mrb[1].mxu1 }
 0x1bf   :  { %v305_v27 = vadd.f32 %v945_v23, %v304_v26  ;;  %v741_v28 = vpop.f32.mrb[2].mxu1 }
 0x1c0   :  { %v369_v30 = vmax.f32 %v313_v25, 0.0  ;;  %v316_v31 = vadd.f32 %v741_v28, %v945_v23  ;;  %v307_v32 = vpop.f32.mrb[3].mxu1 }
 0x1c1   :  { %v367_v33 = vmax.f32 %v305_v27, 0.0  ;;  %v308_v34 = vadd.f32 %v945_v23, %v307_v32  ;;  %v454_v27 = vld [vmem:[#allocation2] sm:$0x1] }
 0x1c2   :  { %v370_v35 = vmax.f32 %v316_v31, 0.0  ;;  %v392_v36 = vmul.f32 %v952_v29, %v369_v30 }
 0x1c3   :  { %v368_v37 = vmax.f32 %v308_v34, 0.0  ;;  %v390_v38 = vmul.f32 %v952_v29, %v367_v33 }
 0x1c4   :  { %v412_v39 = vsel %vm77_vm0, %v392_v36, 0.0  ;;  %v393_v40 = vmul.f32 %v952_v29, %v370_v35 }
 0x1c5   :  { %413 = vadd.xlane.f32.xlu1 %v412_v39  ;;  %v744_v41 = vpop.f32.mrb[4].mxu1  ;;  %v406_v42 = vsel %vm77_vm0, %v390_v38, 0.0  ;;  %v391_v43 = vmul.f32 %v952_v29, %v368_v37 }
 0x1c6   :  { %v329_v44 = vadd.f32 %v744_v41, %v945_v23  ;;  %v320_v45 = vpop.f32.mrb[5].mxu1  ;;  %407 = vadd.xlane.f32.xlu0 %v406_v42  ;;  %v415_v50 = vsel %vm77_vm0, %v393_v40, 0.0 }
 0x1c7   :  { %v321_v46 = vadd.f32 %v945_v23, %v320_v45  ;;  %v745_v47 = vpop.f32.mrb[6].mxu1  ;;  %v409_v54 = vsel %vm77_vm0, %v391_v43, 0.0 }
 0x1c8   :  { %v373_v48 = vmax.f32 %v329_v44, 0.0  ;;  %v323_v49 = vpop.f32.mrb[7].mxu1  ;;  %v332_v52 = vadd.f32 %v745_v47, %v945_v23 }
 0x1c9   :  { %v371_v51 = vmax.f32 %v321_v46, 0.0  ;;  %v324_v53 = vadd.f32 %v945_v23, %v323_v49  ;;  %416 = vadd.xlane.f32.xlu1 %v415_v50 }
 0x1ca   :  { %410 = vadd.xlane.f32.xlu0 %v409_v54  ;;  %v396_v55 = vmul.f32 %v952_v29, %v373_v48  ;;  %v374_v58 = vmax.f32 %v332_v52, 0.0  ;;  %v460_v48 = vlaneseq }
 0x1cb   :  { %v372_v56 = vmax.f32 %v324_v53, 0.0  ;;  %v394_v61 = vmul.f32 %v952_v29, %v371_v51 }
 0x1cc   :  { %v424_v57 = vsel %vm77_vm0, %v396_v55, 0.0  ;;  %v397_v7 = vmul.f32 %v952_v29, %v374_v58  ;;  %v1000_v51 = vshrl.u32 %v460_v48, 7 }
 0x1cd   :  { %v395_v59 = vmul.f32 %v952_v29, %v372_v56  ;;  %v748_v60 = vpop.f32.mrb[8].mxu1  ;;  %v418_v6 = vsel %vm77_vm0, %v394_v61, 0.0 }
 0x1ce   :  { %425 = vadd.xlane.f32.xlu0 %v424_v57  ;;  %v345_v62 = vadd.f32 %v748_v60, %v945_v23  ;;  %v336_v63 = vpop.f32.mrb[9].mxu1  ;;  %v427_v13 = vsel %vm77_vm0, %v397_v7, 0.0 }
 0x1cf   :  { %v421_v0 = vsel %vm77_vm0, %v395_v59, 0.0  ;;  %v337_v1 = vadd.f32 %v945_v23, %v336_v63  ;;  %v749_v2 = vpop.f32.mrb[10].mxu1 }
 0x1d0   :  { %422 = vadd.xlane.f32.xlu1 %v421_v0  ;;  %v377_v3 = vmax.f32 %v345_v62, 0.0  ;;  %v348_v4 = vadd.f32 %v749_v2, %v945_v23  ;;  %v339_v5 = vpop.f32.mrb[11].mxu1  ;;  %v1010_v0 = vand.u32 127, %v460_v48 }
 0x1d1   :  { %v375_v9 = vmax.f32 %v337_v1, 0.0  ;;  %v340_v10 = vadd.f32 %v945_v23, %v339_v5 }
 0x1d2   :  { %419 = vadd.xlane.f32.xlu0 %v418_v6  ;;  %v378_v8 = vmax.f32 %v348_v4, 0.0  ;;  %v400_v11 = vmul.f32 %v952_v29, %v377_v3  ;;  %v550_v4 = vadd.s32 4294967288, %v1010_v0 }
 0x1d3   :  { %v376_v16 = vmax.f32 %v340_v10, 0.0  ;;  %v398_v19 = vmul.f32 %v952_v29, %v375_v9  ;;  %v557_v10 = vadd.s32 4294967280, %v1010_v0 }
 0x1d4   :  { %v401_v12 = vmul.f32 %v952_v29, %v378_v8  ;;  %v436_v17 = vsel %vm77_vm0, %v400_v11, 0.0 }
 0x1d5   :  { %v752_v14 = vpop.f32.mrb[12].mxu1  ;;  %v430_v24 = vsel %vm77_vm0, %v398_v19, 0.0  ;;  %v399_v26 = vmul.f32 %v952_v29, %v376_v16 }
 0x1d6   :  { %428 = vadd.xlane.f32.xlu0 %v427_v13  ;;  %v352_v15 = vpop.f32.mrb[13].mxu1  ;;  %v361_v18 = vadd.f32 %v752_v14, %v945_v23  ;;  %v553_v13 = vsub.s32 %v550_v4, %v1000_v51 }
 0x1d7   :  { %v753_v20 = vpop.f32.mrb[14].mxu1  ;;  %v353_v25 = vadd.f32 %v945_v23, %v352_v15  ;;  %v433_v30 = vsel %vm77_vm0, %v399_v26, 0.0 }
 0x1d8   :  { %v355_v21 = vpop.f32.mrb[15].mxu1  ;;  %v381_v22 = vmax.f32 %v361_v18, 0.0  ;;  %v364_v33 = vadd.f32 %v753_v20, %v945_v23 }
 0x1d9   :  { %v379_v28 = vmax.f32 %v353_v25, 0.0  ;;  %v356_v31 = vadd.f32 %v945_v23, %v355_v21  ;;  %v439_v23 = vsel %vm77_vm0, %v401_v12, 0.0  ;;  %v548_v12 = vsub.s32 %v1010_v0, %v1000_v51 }
 0x1da   :  { %437 = vadd.xlane.f32.xlu0 %v436_v17  ;;  %v404_v32 = vmul.f32 %v952_v29, %v381_v22  ;;  %v382_v37 = vmax.f32 %v364_v33, 0.0  ;;  %v560_v22 = vsub.s32 %v557_v10, %v1000_v51 }
 0x1db   :  { %v380_v34 = vmax.f32 %v356_v31, 0.0  ;;  %v402_v36 = vmul.f32 %v952_v29, %v379_v28 }
 0x1dc   :  { %v448_v35 = vsel %vm77_vm0, %v404_v32, 0.0  ;;  %v405_v41 = vmul.f32 %v952_v29, %v382_v37 }
 0x1dd   :  { %v442_v38 = vsel %vm77_vm0, %v402_v36, 0.0  ;;  %v403_v39 = vmul.f32 %v952_v29, %v380_v34  ;;  %v462_v29 = vsub.s32 0, %v1000_v51  ;;  %v571_v34 = vadd.s32 4294967264, %v1010_v0 }
 0x1de   :  { %431 = vadd.xlane.f32.xlu0 %v430_v24  ;;  %v451_v42 = vsel %vm77_vm0, %v405_v41, 0.0  ;;  %v564_v24 = vadd.s32 4294967272, %v1010_v0 }
 0x1df   :  { %v445_v40 = vsel %vm77_vm0, %v403_v39, 0.0 }
 0x1e0   :  { %v567_v37 = vsub.s32 %v564_v24, %v1000_v51 }
 0x1e1   :  { %457 = vperm.xlu1 %756, %v454_v27  }
 0x1e2   :  { %434 = vadd.xlane.f32.xlu0 %v433_v30 }
 0x1e6   :  { %449 = vadd.xlane.f32.xlu0 %v448_v35 }
 0x1ea   :  { %443 = vadd.xlane.f32.xlu0 %v442_v38 }
 0x1ee   :  { %446 = vadd.xlane.f32.xlu0 %v445_v40  ;;  %v578_v40 = vadd.s32 4294967256, %v1010_v0 }
 0x1f2   :  { %452 = vadd.xlane.f32.xlu0 %v451_v42 }
 0x205   :  { %440 = vadd.xlane.f32.xlu1 %v439_v23 }
 0x252   :  { %v414_v44 = vpop.xlane.xlu1 %413 }
 0x253   :  { %v408_v43 = vpop.xlane.xlu0 %407 }
 0x256   :  { %v417_v47 = vpop.xlane.xlu1 %416 }
 0x257   :  { %v411_v45 = vpop.xlane.xlu0 %410 }
 0x25b   :  { %v426_v46 = vpop.xlane.xlu0 %425 }
 0x25d   :  { %v423_v50 = vpop.xlane.xlu1 %422 }
 0x25f   :  { %v420_v49 = vpop.xlane.xlu0 %419 }
 0x261   :  { %v458_v53 = vpop.permute.xlu1 %457 }
 0x262   :  { %v1003_v55 = vrot.slane %v458_v53, %v462_v29 }
 0x263   :  { %v429_v52 = vpop.xlane.xlu0 %428 }
 0x264   :  { %v464_v56 = vadd.f32 %v1003_v55, %v408_v43  ;;  %v465_v58 = vadd.f32 %v1003_v55, %v411_v45  ;;  %v466_v59 = vadd.f32 %v1003_v55, %v414_v44  ;;  %v467_v61 = vadd.f32 %v1003_v55, %v417_v47 }
 0x265   :  { %v468_v62 = vadd.f32 %v1003_v55, %v420_v49  ;;  %v469_v3 = vadd.f32 %v1003_v55, %v423_v50  ;;  %v470_v6 = vadd.f32 %v1003_v55, %v426_v46  ;;  %v471_v14 = vadd.f32 %v1003_v55, %v429_v52 }
 0x266   :  { %762 = vtanh.f32 %v464_v56  ;;  %v574_v46 = vsub.s32 %v571_v34, %v1000_v51  ;;  %v585_v49 = vadd.s32 4294967248, %v1010_v0  ;;  %v581_v56 = vsub.s32 %v578_v40, %v1000_v51 }
 0x267   :  { %v438_v54 = vpop.xlane.xlu0 %437  ;;  %764 = vtanh.f32 %v465_v58 }
 0x268   :  { %766 = vtanh.f32 %v466_v59  ;;  %v474_v30 = vadd.f32 %v1003_v55, %v438_v54 }
 0x269   :  { %768 = vtanh.f32 %v467_v61 }
 0x26a   :  { %770 = vtanh.f32 %v468_v62  ;;  %v588_v62 = vsub.s32 %v585_v49, %v1000_v51 }
 0x26b   :  { %v432_v57 = vpop.xlane.xlu0 %431  ;;  %772 = vtanh.f32 %v469_v3 }
 0x26c   :  { %774 = vtanh.f32 %v470_v6  ;;  %v472_v17 = vadd.f32 %v1003_v55, %v432_v57  ;;  %v606_v6 = vadd.s32 4294967224, %v1010_v0 }
 0x26d   :  { %776 = vtanh.f32 %v471_v14 }
 0x26e   :  { %778 = vtanh.f32 %v472_v17 }
 0x26f   :  { %v435_v60 = vpop.xlane.xlu0 %434 }
 0x270   :  { %v763_v1 = vpop.eup %762  ;;  %v473_v19 = vadd.f32 %v1003_v55, %v435_v60  ;;  %v592_v60 = vadd.s32 4294967240, %v1010_v0 }
 0x271   :  { %v765_v2 = vpop.eup %764  ;;  %v496_v7 = vadd.f32 1.0, %v763_v1  ;;  %v599_v1 = vadd.s32 4294967232, %v1010_v0 }
 0x272   :  { %v767_v5 = vpop.eup %766  ;;  %v497_v8 = vadd.f32 1.0, %v765_v2  ;;  %780 = vtanh.f32 %v473_v19 }
 0x273   :  { %v450_v63 = vpop.xlane.xlu0 %449  ;;  %v498_v11 = vadd.f32 1.0, %v767_v5  ;;  %v512_v15 = vmul.f32 0.5, %v496_v7  ;;  %v769_v18 = vpop.eup %768  ;;  %782 = vtanh.f32 %v474_v30 }
 0x274   :  { %v513_v16 = vmul.f32 0.5, %v497_v8  ;;  %v771_v25 = vpop.eup %770  ;;  %v499_v26 = vadd.f32 1.0, %v769_v18  ;;  %v478_v43 = vadd.f32 %v1003_v55, %v450_v63 }
 0x275   :  { %v514_v21 = vmul.f32 0.5, %v498_v11  ;;  %v549_v27 = vrot.slane %v512_v15, %v548_v12  ;;  %v773_v31 = vpop.eup %772  ;;  %v500_v32 = vadd.f32 1.0, %v771_v25  ;;  %v613_v11 = vadd.s32 4294967216, %v1010_v0 }
 0x276   :  { %v554_v28 = vrot.slane %v513_v16, %v553_v13  ;;  %v515_v35 = vmul.f32 0.5, %v499_v26  ;;  %v775_v42 = vpop.eup %774  ;;  %v501_v23 = vadd.f32 1.0, %v773_v31  ;;  %v602_v13 = vsub.s32 %v599_v1, %v1000_v51 }
 0x277   :  { %v444_v9 = vpop.xlane.xlu0 %443  ;;  %v561_v33 = vrot.slane %v514_v21, %v560_v22  ;;  %v516_v44 = vmul.f32 0.5, %v500_v32  ;;  %v777_v50 = vpop.eup %776  ;;  %v502_v52 = vadd.f32 1.0, %v775_v42  ;;  %v609_v16 = vsub.s32 %v606_v6, %v1000_v51 }
 0x278   :  { %v556_v36 = vsel %vm555_vm1, %v554_v28, %v549_v27  ;;  %v476_v38 = vadd.f32 %v1003_v55, %v444_v9  ;;  %v568_v48 = vrot.slane %v515_v35, %v567_v37  ;;  %v779_v29 = vpop.eup %778  ;;  %v517_v53 = vmul.f32 0.5, %v501_v23 }
 0x279   :  { %v563_v45 = vsel %vm562_vm2, %v561_v33, %v556_v36  ;;  %v575_v59 = vrot.slane %v516_v44, %v574_v46  ;;  %v503_v63 = vadd.f32 1.0, %v777_v50  ;;  %v518_v2 = vmul.f32 0.5, %v502_v52 }
 0x27a   :  { %784 = vtanh.f32 %v476_v38  ;;  %v570_v54 = vsel %vm569_vm3, %v568_v48, %v563_v45  ;;  %v504_v4 = vadd.f32 1.0, %v779_v29  ;;  %v582_v5 = vrot.slane %v517_v53, %v581_v56 }
 0x27b   :  { %v447_v20 = vpop.xlane.xlu0 %446  ;;  %v577_v3 = vsel %vm576_vm4, %v575_v59, %v570_v54  ;;  %v519_v10 = vmul.f32 0.5, %v503_v63  ;;  %v589_v12 = vrot.slane %v518_v2, %v588_v62  ;;  %v616_v24 = vsub.s32 %v613_v11, %v1000_v51 }
 0x27c   :  { %v477_v41 = vadd.f32 %v1003_v55, %v447_v20  ;;  %v781_v58 = vpop.eup %780  ;;  %v584_v9 = vsel %vm583_vm5, %v582_v5, %v577_v3  ;;  %v520_v14 = vmul.f32 0.5, %v504_v4  ;;  %v620_v25 = vadd.s32 4294967208, %v1010_v0 }
 0x27d   :  { %v505_v7 = vadd.f32 1.0, %v781_v58  ;;  %v783_v8 = vpop.eup %782  ;;  %v591_v19 = vsel %vm590_vm6, %v589_v12, %v584_v9  ;;  %v627_v28 = vadd.s32 4294967200, %v1010_v0  ;;  %v634_v33 = vadd.s32 4294967192, %v1010_v0 }
 0x27e   :  { %786 = vtanh.f32 %v477_v41  ;;  %v506_v20 = vadd.f32 1.0, %v783_v8  ;;  %v603_v27 = vrot.slane %v520_v14, %v602_v13  ;;  %v641_v37 = vadd.s32 4294967184, %v1010_v0 }
 0x27f   :  { %v453_v39 = vpop.xlane.xlu0 %452  ;;  %788 = vtanh.f32 %v478_v43  ;;  %v521_v17 = vmul.f32 0.5, %v505_v7  ;;  %v623_v41 = vsub.s32 %v620_v25, %v1000_v51  ;;  %v630_v43 = vsub.s32 %v627_v28, %v1000_v51 }
 0x280   :  { %v479_v47 = vadd.f32 %v1003_v55, %v453_v39  ;;  %v522_v36 = vmul.f32 0.5, %v506_v20  ;;  %v648_v39 = vadd.s32 4294967176, %v1010_v0  ;;  %v637_v46 = vsub.s32 %v634_v33, %v1000_v51 }
 0x281   :  { %v610_v32 = vrot.slane %v521_v17, %v609_v16  ;;  %v644_v50 = vsub.s32 %v641_v37, %v1000_v51 }
 0x282   :  { %790 = vtanh.f32 %v479_v47  ;;  %v617_v49 = vrot.slane %v522_v36, %v616_v24  ;;  %v651_v0 = vsub.s32 %v648_v39, %v1000_v51 }
 0x284   :  { %v785_v15 = vpop.eup %784 }
 0x285   :  { %v508_v30 = vadd.f32 1.0, %v785_v15 }
 0x287   :  { %v524_v44 = vmul.f32 0.5, %v508_v30 }
 0x288   :  { %v787_v18 = vpop.eup %786 }
 0x289   :  { %v789_v21 = vpop.eup %788  ;;  %v509_v34 = vadd.f32 1.0, %v787_v18  ;;  %v631_v54 = vrot.slane %v524_v44, %v630_v43 }
 0x28a   :  { %v510_v38 = vadd.f32 1.0, %v789_v21 }
 0x28b   :  { %v525_v47 = vmul.f32 0.5, %v509_v34 }
 0x28c   :  { %v791_v26 = vpop.eup %790  ;;  %v526_v52 = vmul.f32 0.5, %v510_v38 }
 0x28d   :  { %v511_v40 = vadd.f32 1.0, %v791_v26 }
 0x28e   :  { %v645_v59 = vrot.slane %v526_v52, %v644_v50 }
 0x28f   :  { %v527_v29 = vmul.f32 0.5, %v511_v40 }
 0x292   :  { %v441_v57 = vpop.xlane.xlu1 %440 }
 0x293   :  { %v475_v61 = vadd.f32 %v1003_v55, %v441_v57  ;;  %v595_v55 = vsub.s32 %v592_v60, %v1000_v51  ;;  %v638_v57 = vrot.slane %v525_v47, %v637_v46 }
 0x295   :  { %792 = vtanh.f32 %v475_v61  ;;  %v596_v22 = vrot.slane %v519_v10, %v595_v55  ;;  %v652_v61 = vrot.slane %v527_v29, %v651_v0 }
 0x297   :  { %v598_v31 = vsel %vm597_vm7, %v596_v22, %v591_v19 }
 0x298   :  { %v605_v23 = vsel %vm604_vm8, %v603_v27, %v598_v31 }
 0x299   :  { %v612_v45 = vsel %vm611_vm9, %v610_v32, %v605_v23 }
 0x29a   :  { %v619_v56 = vsel %vm618_vm10, %v617_v49, %v612_v45 }
 0x29f   :  { %v793_v35 = vpop.eup %792 }
 0x2a0   :  { %v507_v42 = vadd.f32 1.0, %v793_v35 }
 0x2a2   :  { %v523_v48 = vmul.f32 0.5, %v507_v42 }
 0x2a4   :  { %v624_v53 = vrot.slane %v523_v48, %v623_v41 }
 0x2a6   :  { %v626_v58 = vsel %vm625_vm11, %v624_v53, %v619_v56 }
 0x2a7   :  { %v633_v60 = vsel %vm632_vm12, %v631_v54, %v626_v58 }
 0x2a8   :  { %v640_v62 = vsel %vm639_vm13, %v638_v57, %v633_v60 }
 0x2a9   :  { %v647_v63 = vsel %vm646_vm14, %v645_v59, %v640_v62 }
 0x2aa   :  { %v654_v1 = vsel %vm653_vm15, %v652_v61, %v647_v63 }
 0x2ab   :  { %656 = vst [vmem:[#allocation3] sm:$0x1] %v654_v1 }
 0x2ac   :  { %805 = shalt.err (!%p802_p4)
}
 0x2ad   :  { %s806_s23 = scalar_lea.hbm %s1077_s7, 16 }
 0x2ae   :  { %p807_p5 = scmp.ne.s32.totalorder %s1077_s7, %s806_s23  ;;  %p810_p6 = scmp.lt.u32.totalorder %s806_s23, %s1077_s7 }
 0x2b0   :  { %p812_p7 = pnand %p810_p6, %p807_p5 }
 0x2b2   :  { %815 = shalt.err (!%p812_p7)
}
 0x2b3   :  { %666 = dma.vmem_to_hbm [thread:$0]  %s664_s5, 16, %s1077_s7, [#allocation4]  }
 0x2b4   :  { %816 = dma.done.wait [#allocation4], 16  }
 0x2b5   :  { %817 = vsyncadd [#allocation4], 4294967280 }
 0x2b6   :  { %670 = vsyncpa [#allocation4], 1 }

</bundles_post_ra>
